<compile_context>
chip_gen: v7x
topology: tpu7x:2x2x1
jax: 0.10.0
libtpu: 0.0.40
codegen_flags: <defaults>
</compile_context>

<pallas_src>
import functools

import jax
import jax.numpy as jnp
from jax.experimental import pallas as pl
from jax.experimental.pallas import tpu as pltpu

EPS = 1e-5
LANE = 128


def _round_up(n, m):
    return ((n + m - 1) // m) * m


@functools.lru_cache(maxsize=1)
def _chip_budget():
    """(batch-tile cap, vmem_limit_bytes) per TPU generation.

    v7x has 64 MiB VMEM per TensorCore -> conservative defaults.
    v5e / v6e have 128 MiB -> bigger tiles amortize the ~0.35 us per-grid-step
    overhead and get closer to the HBM roofline.
    """
    tile_cap, vmem_limit = 512, 48 * 1024 * 1024
    try:
        info = pltpu.get_tpu_info()
        vmem_bytes = getattr(info, "vmem_capacity_bytes", 0) or 0
        if vmem_bytes >= 96 * 1024 * 1024:
            tile_cap, vmem_limit = 1024, 100 * 1024 * 1024
    except Exception:
        pass
    return tile_cap, vmem_limit


# --------------------------------------------------------------------------- #
# Fused single-tile path: whole network in one pallas_call.
# --------------------------------------------------------------------------- #
def _fused_kernel(apply_bn, valid_rows, tile_rows):
    masked = valid_rows < tile_rows

    def bn_relu(h, g, be):
        # Two-pass batch statistics (numerically robust), computed on the f32
        # activations resident in VMEM; padded batch rows are excluded.
        if masked:
            row = jax.lax.broadcasted_iota(jnp.int32, h.shape, 0)
            valid = row < valid_rows
            hm = jnp.where(valid, h, 0.0)
            mean = jnp.sum(hm, axis=0, keepdims=True) * (1.0 / valid_rows)
            d = jnp.where(valid, h - mean, 0.0)
            var = jnp.sum(d * d, axis=0, keepdims=True) * (1.0 / valid_rows)
        else:
            mean = jnp.mean(h, axis=0, keepdims=True)
            d = h - mean
            var = jnp.mean(d * d, axis=0, keepdims=True)
        scale = g * jax.lax.rsqrt(var + EPS)          # gamma==0 on padded columns
        shift = be - mean * scale
        return jnp.maximum(h * scale + shift, 0.0)

    def kernel(*refs):
        if apply_bn:
            (x_ref, w1_ref, g1_ref, be1_ref, w2_ref, g2_ref, be2_ref,
             w3_ref, b3_ref, out_ref) = refs
        else:
            x_ref, w1_ref, b1_ref, w2_ref, b2_ref, w3_ref, b3_ref, out_ref = refs

        # fc1 (bias dropped when BN applies: mean-subtraction cancels it)
        h = jnp.dot(x_ref[...].astype(jnp.bfloat16), w1_ref[...],
                    preferred_element_type=jnp.float32)
        if apply_bn:
            h = bn_relu(h, g1_ref[...], be1_ref[...])
        else:
            h = jnp.maximum(h + b1_ref[...], 0.0)

        # fc2
        h = jnp.dot(h.astype(jnp.bfloat16), w2_ref[...],
                    preferred_element_type=jnp.float32)
        if apply_bn:
            h = bn_relu(h, g2_ref[...], be2_ref[...])
        else:
            h = jnp.maximum(h + b2_ref[...], 0.0)

        # fc3 keeps its bias
        y = jnp.dot(h.astype(jnp.bfloat16), w3_ref[...],
                    preferred_element_type=jnp.float32) + b3_ref[...]
        out_ref[...] = y.astype(out_ref.dtype)

    return kernel


def _run_fused(x, p, *, apply_bn, valid_rows, vmem_limit):
    bp = x.shape[0]
    c_pad = p["w3"].shape[1]
    if apply_bn:
        args = (x, p["w1"], p["g1"], p["be1"], p["w2"], p["g2"], p["be2"],
                p["w3"], p["b3"])
    else:
        args = (x, p["w1"], p["b1"], p["w2"], p["b2"], p["w3"], p["b3"])
    kernel = _fused_kernel(apply_bn, valid_rows, bp)
    return pl.pallas_call(
        kernel,
        out_shape=jax.ShapeDtypeStruct((bp, c_pad), jnp.float32),
        compiler_params=pltpu.CompilerParams(vmem_limit_bytes=vmem_limit),
    )(*args)


def _fused_fits(tile_rows, in_dim, h_pad, c_pad, vmem_limit):
    w_bytes = (in_dim * h_pad + h_pad * h_pad + h_pad * c_pad) * 2      # bf16
    act_bytes = tile_rows * (in_dim + 2 * h_pad + c_pad) * 4 * 2        # f32 + slack
    return w_bytes + act_bytes < int(0.6 * vmem_limit)


# --------------------------------------------------------------------------- #
# Multi-tile (batch-gridded) path: one pallas_call per fused stage.
# --------------------------------------------------------------------------- #
def _stage_kernel(affine_relu, add_bias, emit_stats, mask_rows, tile_rows):
    """Generic fused stage: y = [relu(x * scale + shift)] @ W [+ b].

    Optionally emits per-tile (sum, sum-of-squares) of y (from the f32
    accumulator, before any downcast) so the wrapper can compute exact batch
    statistics for the *next* stage's BatchNorm.
    """

    def kernel(*refs):
        i = 0
        x_ref = refs[i]; i += 1
        if affine_relu:
            scale_ref, shift_ref = refs[i], refs[i + 1]; i += 2
        w_ref = refs[i]; i += 1
        if add_bias:
            b_ref = refs[i]; i += 1
        out_ref = refs[i]; i += 1
        if emit_stats:
            stats_ref = refs[i]; i += 1

        if affine_relu:
            # folded BatchNorm (scale/shift precomputed in the wrapper) + ReLU, f32
            h = x_ref[...].astype(jnp.float32)
            h = jnp.maximum(h * scale_ref[...] + shift_ref[...], 0.0)
            if mask_rows is not None:
                # zero batch-padding rows so downstream batch stats stay exact
                row = (pl.program_id(0) * tile_rows
                       + jax.lax.broadcasted_iota(jnp.int32, h.shape, 0))
                h = jnp.where(row < mask_rows, h, 0.0)
            lhs = h.astype(jnp.bfloat16)
        else:
            lhs = x_ref[...].astype(jnp.bfloat16)     # no dead f32 pass

        # MXU: bf16 operands, f32 accumulation
        y = jnp.dot(lhs, w_ref[...], preferred_element_type=jnp.float32)
        if add_bias:
            y = y + b_ref[...]
        out_ref[...] = y.astype(out_ref.dtype)        # bf16 for intermediates

        if emit_stats:
            # Direct sub-block stores (no concatenated temporary).
            # NOTE: cross-tile variance is folded as E[y^2]-E[y]^2 in f32; fine
            # for post-fc activations with modest mean/std ratio (a Chan-style
            # combine would be the robust upgrade for extreme cases).
            stats_ref[0, 0:1, :] = jnp.sum(y, axis=0, keepdims=True)
            stats_ref[0, 1:2, :] = jnp.sum(y * y, axis=0, keepdims=True)

    return kernel


def _run_stage(x, w, *, scale=None, shift=None, bias=None, emit_stats=False,
               valid_rows=None, tile_rows, out_dtype=jnp.float32, vmem_limit):
    """One batch-gridded pallas_call for a single fused stage."""
    bp, k = x.shape
    n = w.shape[1]
    num_tiles = bp // tile_rows
    affine_relu = scale is not None
    add_bias = bias is not None
    if emit_stats and not affine_relu:
        # Stats exactness relies on zero-padded x rows AND no pre-BN bias here.
        assert not add_bias, "emit_stats without folded affine requires a bias-free stage"
    mask_rows = (valid_rows
                 if (emit_stats and affine_relu and valid_rows is not None
                     and valid_rows < bp)
                 else None)

    def row_spec(shape):   # one block per grid step
        return pl.BlockSpec(shape, lambda i: (i, 0))

    def res_spec(shape):   # resident across the whole grid
        return pl.BlockSpec(shape, lambda i: (0, 0))

    args, in_specs = [x], [row_spec((tile_rows, k))]
    if affine_relu:
        args += [scale, shift]
        in_specs += [res_spec((1, k)), res_spec((1, k))]
    args.append(w)
    in_specs.append(res_spec((k, n)))
    if add_bias:
        args.append(bias)
        in_specs.append(res_spec((1, n)))

    out_shapes = [jax.ShapeDtypeStruct((bp, n), out_dtype)]
    out_specs = [row_spec((tile_rows, n))]
    if emit_stats:
        out_shapes.append(jax.ShapeDtypeStruct((num_tiles, 2, n), jnp.float32))
        out_specs.append(pl.BlockSpec((1, 2, n), lambda i: (i, 0, 0)))

    kernel = _stage_kernel(affine_relu, add_bias, emit_stats, mask_rows, tile_rows)
    return pl.pallas_call(
        kernel,
        grid=(num_tiles,),
        in_specs=in_specs,
        out_specs=tuple(out_specs),
        out_shape=tuple(out_shapes),
        compiler_params=pltpu.CompilerParams(
            dimension_semantics=("parallel",),     # megacore sharding
            vmem_limit_bytes=vmem_limit),
    )(*args)


def _bn_fold(stats, gamma, beta, n_rows):
    """Reduce per-tile partials -> exact batch mean/var -> folded (scale, shift)."""
    total = jnp.sum(stats[:, 0, :], axis=0, keepdims=True)       # (1, N)
    total_sq = jnp.sum(stats[:, 1, :], axis=0, keepdims=True)    # (1, N)
    mean = total / n_rows
    var = jnp.maximum(total_sq / n_rows - mean * mean, 0.0)      # biased variance
    scale = gamma * jax.lax.rsqrt(var + EPS)                     # 0 on padded columns
    shift = beta - mean * scale
    return scale, shift


# --------------------------------------------------------------------------- #
# Forward
# --------------------------------------------------------------------------- #
@functools.partial(jax.jit, static_argnames=("num_classes", "max_tile_b"))
def simplenn_forward(x, params, *, num_classes, max_tile_b=None):
    """x: (B, input_size) f32.  params: see init_params (lane-padded, bf16 weights)."""
    p = params
    b = x.shape[0]
    in_dim = x.shape[1]
    h_pad = p["w2"].shape[0]
    c_pad = p["w3"].shape[1]
    apply_bn = b > 1                                  # matches `if out.shape[0] > 1`

    tile_cap, vmem_limit = _chip_budget()
    if max_tile_b is not None:
        tile_cap = max_tile_b                         # test / tuning override

    # Balanced batch tiling (avoids padding blowup), 16-row rounding for bf16 packing.
    num_t = -(-b // tile_cap)
    tile_rows = min(_round_up(-(-b // num_t), 16), _round_up(tile_cap, 16))
    b_pad = _round_up(b, tile_rows)
    num_tiles = b_pad // tile_rows
    if b_pad != b:
        x = jnp.pad(x, ((0, b_pad - b), (0, 0)))

    # Fused single-call path: BN stats are tile-local, so no cross-tile reduce.
    if num_tiles == 1 and _fused_fits(tile_rows, in_dim, h_pad, c_pad, vmem_limit):
        out = _run_fused(x, p, apply_bn=apply_bn, valid_rows=b,
                         vmem_limit=vmem_limit)
        return out[:b, :num_classes]

    if apply_bn:
        # fc1 (bias dropped: BN's mean-subtract cancels it) + per-tile BN partials.
        h1, stats1 = _run_stage(x, p["w1"], emit_stats=True, valid_rows=b,
                                tile_rows=tile_rows, out_dtype=jnp.bfloat16,
                                vmem_limit=vmem_limit)
        sc1, sh1 = _bn_fold(stats1, p["g1"], p["be1"], b)
        # bn1 + relu folded into the fc2 stage; again emit BN partials.
        h2, stats2 = _run_stage(h1, p["w2"], scale=sc1, shift=sh1, emit_stats=True,
                                valid_rows=b, tile_rows=tile_rows,
                                out_dtype=jnp.bfloat16, vmem_limit=vmem_limit)
        sc2, sh2 = _bn_fold(stats2, p["g2"], p["be2"], b)
        # bn2 + relu folded into the fc3 stage (fc3 keeps its bias).
        (out,) = _run_stage(h2, p["w3"], scale=sc2, shift=sh2, bias=p["b3"],
                            tile_rows=tile_rows, vmem_limit=vmem_limit)
    else:
        # no BatchNorm; scale=1 / shift=0 turns the folded affine into plain ReLU.
        one = jnp.ones_like(p["be1"])
        zero = jnp.zeros_like(p["be1"])
        (h1,) = _run_stage(x, p["w1"], bias=p["b1"], tile_rows=tile_rows,
                           out_dtype=jnp.bfloat16, vmem_limit=vmem_limit)
        (h2,) = _run_stage(h1, p["w2"], scale=one, shift=zero, bias=p["b2"],
                           tile_rows=tile_rows, out_dtype=jnp.bfloat16,
                           vmem_limit=vmem_limit)
        (out,) = _run_stage(h2, p["w3"], scale=one, shift=zero, bias=p["b3"],
                            tile_rows=tile_rows, vmem_limit=vmem_limit)

    return out[:b, :num_classes]


def init_params(key, input_size, hidden_size, num_classes):
    """Weights stored pre-transposed (in, out), feature dims padded to 128 lanes,
    matmul operands in bf16; biases / BN affine params in f32 on the padded width."""
    h_pad = _round_up(hidden_size, LANE)
    c_pad = _round_up(num_classes, LANE)
    ks = jax.random.split(key, 6)

    def linear(kw, kb, fan_in, fan_out, in_pad, out_pad):
        bound = 1.0 / (fan_in ** 0.5)
        w = jax.random.uniform(kw, (fan_in, fan_out), jnp.float32, -bound, bound)
        bias = jax.random.uniform(kb, (1, fan_out), jnp.float32, -bound, bound)
        w = jnp.pad(w, ((0, in_pad - fan_in), (0, out_pad - fan_out)))
        bias = jnp.pad(bias, ((0, 0), (0, out_pad - fan_out)))
        return w.astype(jnp.bfloat16), bias

    w1, b1 = linear(ks[0], ks[1], input_size, hidden_size, input_size, h_pad)
    w2, b2 = linear(ks[2], ks[3], hidden_size, hidden_size, h_pad, h_pad)
    w3, b3 = linear(ks[4], ks[5], hidden_size, num_classes, h_pad, c_pad)
    # gamma = 1 on real columns, 0 on lane padding (keeps padded columns at zero
    # through BatchNorm); beta = 0.
    gamma = jnp.pad(jnp.ones((1, hidden_size), jnp.float32),
                    ((0, 0), (0, h_pad - hidden_size)))
    beta = jnp.zeros((1, h_pad), jnp.float32)
    return {"w1": w1, "b1": b1, "g1": gamma, "be1": beta,
            "w2": w2, "b2": b2, "g2": gamma, "be2": beta,
            "w3": w3, "b3": b3}


def _reference(x, p, num_classes):
    """Pure-JAX mirror of the PyTorch forward (training-mode BN, bf16 matmul operands)."""
    # TODO(synk): BatchNorm running-stat buffer updates (training-time side state)
    # are not modeled; forward output uses batch statistics, matching the spec.
    def mm(a, w):
        return jnp.dot(a.astype(jnp.bfloat16).astype(jnp.float32),
                       w.astype(jnp.float32))

    def bn(h, g, b):
        m = jnp.mean(h, axis=0, keepdims=True)
        v = jnp.mean((h - m) ** 2, axis=0, keepdims=True)
        return (h - m) / jnp.sqrt(v + EPS) * g + b

    apply_bn = x.shape[0] > 1
    h = mm(x, p["w1"]) + p["b1"]
    if apply_bn:
        h = bn(h, p["g1"], p["be1"])
    h = jnp.maximum(h, 0.0)
    h = mm(h, p["w2"]) + p["b2"]
    if apply_bn:
        h = bn(h, p["g2"], p["be2"])
    h = jnp.maximum(h, 0.0)
    out = mm(h, p["w3"]) + p["b3"]
    return out[:, :num_classes]


if __name__ == "__main__":
    key = jax.random.PRNGKey(0)
    k_x, k_p, k_x2 = jax.random.split(key, 3)

    input_size, hidden_size, num_classes = 32, 32, 8
    params = init_params(k_p, input_size, hidden_size, num_classes)

    # 1) Typical small batch: BN path, fully fused single pallas_call.
    x = jax.random.normal(k_x, (8, input_size), jnp.float32)
    out = jax.block_until_ready(simplenn_forward(x, params, num_classes=num_classes))
    ref = _reference(x, params, num_classes)
    assert out.shape == (8, num_classes)
    assert jnp.allclose(out, ref, atol=2e-2, rtol=2e-2), "fused BN path mismatch"

    # 2) batch == 1: BatchNorm skipped (matches `if out.shape[0] > 1`), fused path.
    x1 = x[:1]
    out1 = jax.block_until_ready(simplenn_forward(x1, params, num_classes=num_classes))
    ref1 = _reference(x1, params, num_classes)
    assert jnp.allclose(out1, ref1, atol=2e-2, rtol=2e-2), "batch-1 path mismatch"

    # 3) Multi-tile gridded path (force small tiles so it's exercised at small shapes):
    #    batch padding, per-tile BN partials, bf16 intermediates, folded affine.
    x3 = jax.random.normal(k_x2, (40, input_size), jnp.float32)
    out3 = jax.block_until_ready(
        simplenn_forward(x3, params, num_classes=num_classes, max_tile_b=16))
    ref3 = _reference(x3, params, num_classes)
    assert out3.shape == (40, num_classes)
    assert jnp.allclose(out3, ref3, atol=5e-2, rtol=5e-2), "multi-tile path mismatch"

    print("KERNEL_OK")
</pallas_src>

<mosaic_0001>
module attributes {stable_mosaic.version = 11 : i64} {
  func.func @kernel(%arg0: memref<16x32xf32, #tpu.memory_space<vmem>>, %arg1: memref<32x128xbf16, #tpu.memory_space<vmem>>, %arg2: memref<1x128xf32, #tpu.memory_space<vmem>>, %arg3: memref<1x128xf32, #tpu.memory_space<vmem>>, %arg4: memref<128x128xbf16, #tpu.memory_space<vmem>>, %arg5: memref<1x128xf32, #tpu.memory_space<vmem>>, %arg6: memref<1x128xf32, #tpu.memory_space<vmem>>, %arg7: memref<128x128xbf16, #tpu.memory_space<vmem>>, %arg8: memref<1x128xf32, #tpu.memory_space<vmem>>, %arg9: memref<16x128xf32, #tpu.memory_space<vmem>>) attributes {dimension_semantics = [], scalar_prefetch = 0 : i64, scratch_operands = 0 : i64, tpu.core_type = #tpu.core_type<tc>} {
    %c0 = arith.constant 0 : index
    %c0_0 = arith.constant 0 : index
    %0 = vector.load %arg0[%c0, %c0_0] : memref<16x32xf32, #tpu.memory_space<vmem>>, vector<16x32xf32>
    %1 = arith.truncf %0 : vector<16x32xf32> to vector<16x32xbf16>
    %c0_1 = arith.constant 0 : index
    %c0_2 = arith.constant 0 : index
    %2 = vector.load %arg1[%c0_1, %c0_2] : memref<32x128xbf16, #tpu.memory_space<vmem>>, vector<32x128xbf16>
    %cst = arith.constant dense<0.000000e+00> : vector<16x128xf32>
    %3 = tpu.matmul %1, %2, %cst {dimension_numbers = #tpu.dot_dimension_numbers<[1], [0], [0], [1], [0, 0, 1, 1], [], []>} : vector<16x32xbf16>, vector<32x128xbf16>, vector<16x128xf32> -> vector<16x128xf32>
    %c0_3 = arith.constant 0 : index
    %c0_4 = arith.constant 0 : index
    %4 = vector.load %arg2[%c0_3, %c0_4] : memref<1x128xf32, #tpu.memory_space<vmem>>, vector<1x128xf32>
    %c0_5 = arith.constant 0 : index
    %c0_6 = arith.constant 0 : index
    %5 = vector.load %arg3[%c0_5, %c0_6] : memref<1x128xf32, #tpu.memory_space<vmem>>, vector<1x128xf32>
    %6 = tpu.iota {dimensions = array<i32: 0>} : vector<16x128xi32>
    %c8_i32 = arith.constant 8 : i32
    %7 = vector.broadcast %c8_i32 : i32 to vector<16x128xi32>
    %8 = arith.cmpi slt, %6, %7 : vector<16x128xi32>
    %cst_7 = arith.constant 0.000000e+00 : f32
    %9 = vector.broadcast %cst_7 : f32 to vector<16x128xf32>
    %10 = arith.select %8, %3, %9 : vector<16x128xi1>, vector<16x128xf32>
    %cst_8 = arith.constant dense<0.000000e+00> : vector<128xf32>
    %11 = vector.multi_reduction <add>, %10, %cst_8 [0] : vector<16x128xf32> to vector<128xf32>
    %12 = vector.shape_cast %11 : vector<128xf32> to vector<1x128xf32>
    %cst_9 = arith.constant 1.250000e-01 : f32
    %13 = vector.broadcast %cst_9 : f32 to vector<1x128xf32>
    %14 = arith.mulf %12, %13 : vector<1x128xf32>
    %15 = vector.broadcast %14 : vector<1x128xf32> to vector<16x128xf32>
    %16 = arith.subf %3, %15 : vector<16x128xf32>
    %cst_10 = arith.constant 0.000000e+00 : f32
    %17 = vector.broadcast %cst_10 : f32 to vector<16x128xf32>
    %18 = arith.select %8, %16, %17 : vector<16x128xi1>, vector<16x128xf32>
    %19 = arith.mulf %18, %18 : vector<16x128xf32>
    %cst_11 = arith.constant dense<0.000000e+00> : vector<128xf32>
    %20 = vector.multi_reduction <add>, %19, %cst_11 [0] : vector<16x128xf32> to vector<128xf32>
    %21 = vector.shape_cast %20 : vector<128xf32> to vector<1x128xf32>
    %cst_12 = arith.constant 1.250000e-01 : f32
    %22 = vector.broadcast %cst_12 : f32 to vector<1x128xf32>
    %23 = arith.mulf %21, %22 : vector<1x128xf32>
    %cst_13 = arith.constant 9.99999974E-6 : f32
    %24 = vector.broadcast %cst_13 : f32 to vector<1x128xf32>
    %25 = arith.addf %23, %24 : vector<1x128xf32>
    %26 = math.rsqrt %25 : vector<1x128xf32>
    %27 = arith.mulf %4, %26 : vector<1x128xf32>
    %28 = arith.mulf %14, %27 : vector<1x128xf32>
    %29 = arith.subf %5, %28 : vector<1x128xf32>
    %30 = vector.broadcast %27 : vector<1x128xf32> to vector<16x128xf32>
    %31 = arith.mulf %3, %30 : vector<16x128xf32>
    %32 = vector.broadcast %29 : vector<1x128xf32> to vector<16x128xf32>
    %33 = arith.addf %31, %32 : vector<16x128xf32>
    %cst_14 = arith.constant 0.000000e+00 : f32
    %34 = vector.broadcast %cst_14 : f32 to vector<16x128xf32>
    %35 = arith.maximumf %33, %34 : vector<16x128xf32>
    %36 = arith.truncf %35 : vector<16x128xf32> to vector<16x128xbf16>
    %c0_15 = arith.constant 0 : index
    %c0_16 = arith.constant 0 : index
    %37 = vector.load %arg4[%c0_15, %c0_16] : memref<128x128xbf16, #tpu.memory_space<vmem>>, vector<128x128xbf16>
    %cst_17 = arith.constant dense<0.000000e+00> : vector<16x128xf32>
    %38 = tpu.matmul %36, %37, %cst_17 {dimension_numbers = #tpu.dot_dimension_numbers<[1], [0], [0], [1], [0, 0, 1, 1], [], []>} : vector<16x128xbf16>, vector<128x128xbf16>, vector<16x128xf32> -> vector<16x128xf32>
    %c0_18 = arith.constant 0 : index
    %c0_19 = arith.constant 0 : index
    %39 = vector.load %arg5[%c0_18, %c0_19] : memref<1x128xf32, #tpu.memory_space<vmem>>, vector<1x128xf32>
    %c0_20 = arith.constant 0 : index
    %c0_21 = arith.constant 0 : index
    %40 = vector.load %arg6[%c0_20, %c0_21] : memref<1x128xf32, #tpu.memory_space<vmem>>, vector<1x128xf32>
    %41 = tpu.iota {dimensions = array<i32: 0>} : vector<16x128xi32>
    %c8_i32_22 = arith.constant 8 : i32
    %42 = vector.broadcast %c8_i32_22 : i32 to vector<16x128xi32>
    %43 = arith.cmpi slt, %41, %42 : vector<16x128xi32>
    %cst_23 = arith.constant 0.000000e+00 : f32
    %44 = vector.broadcast %cst_23 : f32 to vector<16x128xf32>
    %45 = arith.select %43, %38, %44 : vector<16x128xi1>, vector<16x128xf32>
    %cst_24 = arith.constant dense<0.000000e+00> : vector<128xf32>
    %46 = vector.multi_reduction <add>, %45, %cst_24 [0] : vector<16x128xf32> to vector<128xf32>
    %47 = vector.shape_cast %46 : vector<128xf32> to vector<1x128xf32>
    %cst_25 = arith.constant 1.250000e-01 : f32
    %48 = vector.broadcast %cst_25 : f32 to vector<1x128xf32>
    %49 = arith.mulf %47, %48 : vector<1x128xf32>
    %50 = vector.broadcast %49 : vector<1x128xf32> to vector<16x128xf32>
    %51 = arith.subf %38, %50 : vector<16x128xf32>
    %cst_26 = arith.constant 0.000000e+00 : f32
    %52 = vector.broadcast %cst_26 : f32 to vector<16x128xf32>
    %53 = arith.select %43, %51, %52 : vector<16x128xi1>, vector<16x128xf32>
    %54 = arith.mulf %53, %53 : vector<16x128xf32>
    %cst_27 = arith.constant dense<0.000000e+00> : vector<128xf32>
    %55 = vector.multi_reduction <add>, %54, %cst_27 [0] : vector<16x128xf32> to vector<128xf32>
    %56 = vector.shape_cast %55 : vector<128xf32> to vector<1x128xf32>
    %cst_28 = arith.constant 1.250000e-01 : f32
    %57 = vector.broadcast %cst_28 : f32 to vector<1x128xf32>
    %58 = arith.mulf %56, %57 : vector<1x128xf32>
    %cst_29 = arith.constant 9.99999974E-6 : f32
    %59 = vector.broadcast %cst_29 : f32 to vector<1x128xf32>
    %60 = arith.addf %58, %59 : vector<1x128xf32>
    %61 = math.rsqrt %60 : vector<1x128xf32>
    %62 = arith.mulf %39, %61 : vector<1x128xf32>
    %63 = arith.mulf %49, %62 : vector<1x128xf32>
    %64 = arith.subf %40, %63 : vector<1x128xf32>
    %65 = vector.broadcast %62 : vector<1x128xf32> to vector<16x128xf32>
    %66 = arith.mulf %38, %65 : vector<16x128xf32>
    %67 = vector.broadcast %64 : vector<1x128xf32> to vector<16x128xf32>
    %68 = arith.addf %66, %67 : vector<16x128xf32>
    %cst_30 = arith.constant 0.000000e+00 : f32
    %69 = vector.broadcast %cst_30 : f32 to vector<16x128xf32>
    %70 = arith.maximumf %68, %69 : vector<16x128xf32>
    %71 = arith.truncf %70 : vector<16x128xf32> to vector<16x128xbf16>
    %c0_31 = arith.constant 0 : index
    %c0_32 = arith.constant 0 : index
    %72 = vector.load %arg7[%c0_31, %c0_32] : memref<128x128xbf16, #tpu.memory_space<vmem>>, vector<128x128xbf16>
    %cst_33 = arith.constant dense<0.000000e+00> : vector<16x128xf32>
    %73 = tpu.matmul %71, %72, %cst_33 {dimension_numbers = #tpu.dot_dimension_numbers<[1], [0], [0], [1], [0, 0, 1, 1], [], []>} : vector<16x128xbf16>, vector<128x128xbf16>, vector<16x128xf32> -> vector<16x128xf32>
    %c0_34 = arith.constant 0 : index
    %c0_35 = arith.constant 0 : index
    %74 = vector.load %arg8[%c0_34, %c0_35] : memref<1x128xf32, #tpu.memory_space<vmem>>, vector<1x128xf32>
    %75 = vector.broadcast %74 : vector<1x128xf32> to vector<16x128xf32>
    %76 = arith.addf %73, %75 : vector<16x128xf32>
    %c0_36 = arith.constant 0 : index
    %c0_37 = arith.constant 0 : index
    %77 = vector.load %arg9[%c0_36, %c0_37] : memref<16x128xf32, #tpu.memory_space<vmem>>, vector<16x128xf32>
    tpu.vector_store %arg9[%c0_36, %c0_37], %76 {strides = array<i32>} : memref<16x128xf32, #tpu.memory_space<vmem>>, vector<16x128xf32>,
    return
  }
}

</mosaic_0001>

<bundles_post_ra>
// kernel: simplenn_forward.1
= control target key start
LH: loop header
LB: loop body
LE: loop exit
PB: predicated region body
PF: predicated region fallthrough
CT: control target
= control target key end

     0   :  { %14 = vsyncpa [#allocation3], 0  ;;  %s760_s0 = inlined_call_operand.vmem [shape: f32[16,32], index: 0, kind: input, shape index: {}]   ;;  %s761_s1 = inlined_call_operand.vmem [shape: bf16[32,128], index: 1, kind: input, shape index: {}]   ;;  %s762_s2 = inlined_call_operand.vmem [shape: f32[1,128], index: 2, kind: input, shape index: {}]   ;;  %s763_s3 = inlined_call_operand.vmem [shape: f32[1,128], index: 3, kind: input, shape index: {}]   ;;  %s764_s4 = inlined_call_operand.hbm [shape: bf16[128,128], index: 4, kind: input, shape index: {}]   ;;  %s765_s5 = inlined_call_operand.vmem [shape: f32[1,128], index: 5, kind: input, shape index: {}]   ;;  %s766_s6 = inlined_call_operand.vmem [shape: f32[1,128], index: 6, kind: input, shape index: {}]   ;;  %s767_s7 = inlined_call_operand.hbm [shape: bf16[128,128], index: 7, kind: input, shape index: {}]   ;;  %s768_s8 = inlined_call_operand.vmem [shape: f32[1,128], index: 8, kind: input, shape index: {}]   ;;  %s769_s9 = inlined_call_operand.vmem [shape: f32[16,128], index: 9, kind: output, shape index: {}]  }
   0x1   :  { %15 = vsyncpa [#allocation5], 0  ;;  %s620_s30 = smov [#allocation2]   ;;  %s572_s13 = scalar_lea.hbm %s764_s4, 1024 }
   0x2   :  { %s29_s10 = sshll.u32 %s620_s30, 4  ;;  %p573_p0 = scmp.ne.s32.totalorder %s764_s4, %s572_s13  ;;  %s30_s10 = int_to_ptr.vmem [resolvable:$true] %s29_s10 }
   0x3   :  { %p576_p1 = scmp.lt.u32.totalorder %s572_s13, %s764_s4 }
   0x5   :  { %p578_p2 = pnand %p576_p1, %p573_p0 }
   0x7   :  { %581 = shalt.err (!%p578_p2)
}
   0x8   :  { %s582_s18 = scalar_lea.vmem %s30_s10, 1024  ;;  %p587_p4 = scmp.lt.s32.totalorder %s30_s10, %s30_s10 }
   0x9   :  { %p583_p3 = scmp.ne.s32.totalorder %s30_s10, %s582_s18  ;;  %p588_p5 = scmp.lt.s32.totalorder %s582_s18, %s582_s18 }
   0xb   :  { %p589_p6 = por %p588_p5, %p587_p4 }
   0xd   :  { %p590_p7 = pnand %p589_p6, %p583_p3 }
   0xf   :  { %593 = shalt.err (!%p590_p7)
}
  0x10   :  { %s621_s19 = smov 64   ;;  %s622_s20 = smov 4  }
  0x11   :  { %35 = dma.hbm_to_vmem [thread:$0]  %s764_s4, 1024, %s30_s10, [#allocation3], %s621_s19, %s621_s19, %s622_s20  }
  0x12   :  { %s623_s23 = smov [#allocation4]   ;;  %s594_s27 = scalar_lea.hbm %s767_s7, 1024 }
  0x13   :  { %s45_s24 = sshll.u32 %s623_s23, 4  ;;  %p595_p8 = scmp.ne.s32.totalorder %s767_s7, %s594_s27  ;;  %s46_s24 = int_to_ptr.vmem [resolvable:$true] %s45_s24 }
  0x14   :  { %p598_p9 = scmp.lt.u32.totalorder %s594_s27, %s767_s7 }
  0x16   :  { %p600_p10 = pnand %p598_p9, %p595_p8 }
  0x18   :  { %603 = shalt.err (!%p600_p10)
}
  0x19   :  { %s604_s12 = scalar_lea.vmem %s46_s24, 1024  ;;  %p609_p12 = scmp.lt.s32.totalorder %s46_s24, %s46_s24 }
  0x1a   :  { %p605_p11 = scmp.ne.s32.totalorder %s46_s24, %s604_s12  ;;  %p610_p13 = scmp.lt.s32.totalorder %s604_s12, %s604_s12 }
  0x1c   :  { %p611_p0 = por %p610_p13, %p609_p12 }
  0x1e   :  { %p612_p1 = pnand %p611_p0, %p605_p11 }
  0x20   :  { %615 = shalt.err (!%p612_p1)
}
  0x21   :  { %51 = dma.hbm_to_vmem [thread:$0]  %s767_s7, 1024, %s46_s24, [#allocation5], %s621_s19, %s621_s19, %s622_s20  }
  0x22   :  { %616 = dma.done.wait [#allocation3], 1024  }
  0x23   :  { %617 = vsyncadd [#allocation3], 4294966272 }
  0x24   :  { %618 = dma.done.wait [#allocation5], 1024  }
  0x25   :  { %619 = vsyncadd [#allocation5], 4294966272  ;;  %v624_v0 = vmov 0.0   ;;  %vm625_vm0 = vmmov 0   ;;  %v550_v1 = vld [vmem:[%s761_s1] sm:$0xff]   ;;  %v551_v2 = vld [vmem:[%s761_s1 + $0x8] sm:$0xff]   ;;  %v162_v35 = vlaneseq }
  0x26   :  { %496 = vmatprep.subr.bf16.mxu0 %v624_v0  ;;  %500 = vmatprep.mubr.msk.bf16.mxu0 %vm625_vm0, %v624_v0  ;;  %v61_v3 = vld [vmem:[%s760_s0] sm:$0xff]  ;;  %v62_v4 = vld [vmem:[%s760_s0 + $0x8] sm:$0xff]  ;;  %vm80_vm1 = vcmask 261120   ;;  %v552_v6 = vld [vmem:[#allocation2] sm:$0xff]  }
  0x27   :  { %504 = vmatprep.subr.bf16.mxu1 %v624_v0  ;;  %520 = vmatprep.mubr.msk.bf16.mxu1 %vm625_vm0, %v624_v0  ;;  %v63_v5 = vpack.c.bf16 %v62_v4, %v61_v3  ;;  %v553_v7 = vld [vmem:[#allocation2 + $0x8] sm:$0xff]   ;;  %v554_v8 = vld [vmem:[#allocation2 + $0x10] sm:$0xff]   ;;  %v555_v9 = vld [vmem:[#allocation2 + $0x18] sm:$0xff]   ;;  %v163_v36 = vshrl.u32 %v162_v35, 7 }
  0x28   :  { %497 = vmatpush3.bf16.msra.mxu0 %v550_v1  ;;  %505 = vmatpush3.bf16.msra.mxu1 %v552_v6  ;;  %v556_v10 = vld [vmem:[#allocation2 + $0x20] sm:$0xff]   ;;  %v557_v11 = vld [vmem:[#allocation2 + $0x28] sm:$0xff]   ;;  %v558_v12 = vld [vmem:[#allocation2 + $0x30] sm:$0xff]  }
  0x29   :  { %498 = vmatprep.subr.bf16.mxu0 %v624_v0  ;;  %506 = vmatprep.subr.bf16.mxu1 %v624_v0  ;;  %v559_v13 = vld [vmem:[#allocation2 + $0x38] sm:$0xff]   ;;  %v125_v37 = vld [vmem:[%s762_s2] sm:$0x1]  ;;  %v729_v38 = vsub.s32 0, %v163_v36  ;;  %v560_v53 = vld [vmem:[#allocation4] sm:$0xff]  }
  0x2a   :  { %v126_v41 = vld [vmem:[%s763_s3] sm:$0x1]  ;;  %v561_v54 = vld [vmem:[#allocation4 + $0x8] sm:$0xff]   ;;  %v563_v56 = vld [vmem:[#allocation4 + $0x18] sm:$0xff]  }
  0x2b   :  { %v562_v55 = vld [vmem:[#allocation4 + $0x10] sm:$0xff]   ;;  %v564_v57 = vld [vmem:[#allocation4 + $0x20] sm:$0xff]   ;;  %v565_v58 = vld [vmem:[#allocation4 + $0x28] sm:$0xff]  }
  0x2c   :  { %499 = vmatpush3.bf16.msra.mxu0 %v551_v2  ;;  %507 = vmatpush3.bf16.msra.mxu1 %v553_v7  ;;  %v566_v59 = vld [vmem:[#allocation4 + $0x30] sm:$0xff]   ;;  %v567_v60 = vld [vmem:[#allocation4 + $0x38] sm:$0xff]  }
  0x2d   :  { %524 = vmatprep.subr.bf16.mxu0 %v624_v0  ;;  %508 = vmatprep.subr.bf16.mxu1 %v624_v0 }
  0x2f   :  { %501 = vmatmul.mubr.msk.bf16.vlgmr.msra.gmra.mrb[0].mxu0 %vm80_vm1, %v63_v5 }
  0x30   :  { %540 = vmatprep.mubr.msk.bf16.mxu0 %vm625_vm0, %v624_v0  ;;  %509 = vmatpush3.bf16.msra.mxu1 %v554_v8 }
  0x31   :  { %510 = vmatprep.subr.bf16.mxu1 %v624_v0  ;;  %525 = vmatpush3.bf16.msra.mxu0 %v560_v53 }
  0x32   :  { %526 = vmatprep.subr.bf16.mxu0 %v624_v0 }
  0x34   :  { %511 = vmatpush3.bf16.msra.mxu1 %v555_v9 }
  0x35   :  { %512 = vmatprep.subr.bf16.mxu1 %v624_v0  ;;  %527 = vmatpush3.bf16.msra.mxu0 %v561_v54 }
  0x36   :  { %528 = vmatprep.subr.bf16.mxu0 %v624_v0 }
  0x38   :  { %513 = vmatpush3.bf16.msra.mxu1 %v556_v10 }
  0x39   :  { %514 = vmatprep.subr.bf16.mxu1 %v624_v0  ;;  %529 = vmatpush3.bf16.msra.mxu0 %v562_v55 }
  0x3a   :  { %530 = vmatprep.subr.bf16.mxu0 %v624_v0 }
  0x3c   :  { %515 = vmatpush3.bf16.msra.mxu1 %v557_v11 }
  0x3d   :  { %516 = vmatprep.subr.bf16.mxu1 %v624_v0  ;;  %531 = vmatpush3.bf16.msra.mxu0 %v563_v56 }
  0x3e   :  { %532 = vmatprep.subr.bf16.mxu0 %v624_v0 }
  0x40   :  { %517 = vmatpush3.bf16.msra.mxu1 %v558_v12 }
  0x41   :  { %518 = vmatprep.subr.bf16.mxu1 %v624_v0  ;;  %533 = vmatpush3.bf16.msra.mxu0 %v564_v57 }
  0x42   :  { %534 = vmatprep.subr.bf16.mxu0 %v624_v0 }
  0x44   :  { %519 = vmatpush3.bf16.msra.mxu1 %v559_v13 }
  0x45   :  { %535 = vmatpush3.bf16.msra.mxu0 %v565_v58 }
  0x46   :  { %536 = vmatprep.subr.bf16.mxu0 %v624_v0 }
  0x49   :  { %537 = vmatpush3.bf16.msra.mxu0 %v566_v59 }
  0x4a   :  { %538 = vmatprep.subr.bf16.mxu0 %v624_v0 }
  0x4d   :  { %539 = vmatpush3.bf16.msra.mxu0 %v567_v60 }
 0x102   :  { %v118_v14 = vpop.f32.mrb[0].mxu0 }
 0x103   :  { %v135_v15 = vrot.slane %v118_v14, 4  ;;  %v502_v16 = vpop.f32.mrb[1].mxu0 }
 0x104   :  { %v121_v17 = vpop.f32.mrb[2].mxu0 }
 0x105   :  { %v136_v18 = vadd.f32 %v135_v15, %v118_v14  ;;  %v503_v19 = vpop.f32.mrb[3].mxu0 }
 0x107   :  { %v137_v20 = vrot.slane %v136_v18, 2 }
 0x109   :  { %v138_v21 = vadd.f32 %v137_v20, %v136_v18  ;;  %v285_v18 = vld [vmem:[%s765_s5] sm:$0x1] }
 0x10b   :  { %v139_v22 = vrot.slane %v138_v21, 1 }
 0x10d   :  { %v140_v23 = vadd.f32 %v139_v22, %v138_v21  ;;  %v286_v21 = vld [vmem:[%s766_s6] sm:$0x1] }
 0x10f   :  { %v141_v24 = vmul.f32 0.125, %v140_v23 }
 0x111   :  { %v142_v25 = vsub.f32 %v118_v14, %v141_v24 }
 0x113   :  { %v146_v26 = vmul.f32 %v142_v25, %v142_v25 }
 0x115   :  { %v149_v27 = vrot.slane %v146_v26, 4 }
 0x117   :  { %v150_v28 = vadd.f32 %v149_v27, %v146_v26 }
 0x119   :  { %v151_v29 = vrot.slane %v150_v28, 2 }
 0x11b   :  { %v152_v30 = vadd.f32 %v151_v29, %v150_v28 }
 0x11d   :  { %v153_v31 = vrot.slane %v152_v30, 1 }
 0x11f   :  { %v154_v32 = vadd.f32 %v153_v31, %v152_v30 }
 0x121   :  { %v155_v33 = vmul.f32 0.125, %v154_v32 }
 0x123   :  { %v156_v34 = vadd.f32 1e-05, %v155_v33  ;;  %v466_v33 = vld [vmem:[%s768_s8] ss:$0 sm:$0xff] }
 0x125   :  { %568 = vrsqrt.f32 %v156_v34 }
 0x12f   :  { %v569_v39 = vpop.eup %568 }
 0x130   :  { %v158_v40 = vmul.f32 %v569_v39, %v125_v37 }
 0x132   :  { %v159_v42 = vmul.f32 %v158_v40, %v141_v24  ;;  %v165_v43 = vrot.slane %v158_v40, %v729_v38 }
 0x134   :  { %v160_v44 = vsub.f32 %v126_v41, %v159_v42  ;;  %v168_v45 = vmul.f32 %v165_v43, %v121_v17  ;;  %v167_v46 = vmul.f32 %v165_v43, %v118_v14 }
 0x136   :  { %v173_v47 = vrot.slane %v160_v44, %v729_v38 }
 0x138   :  { %v176_v48 = vadd.f32 %v173_v47, %v168_v45  ;;  %v175_v49 = vadd.f32 %v173_v47, %v167_v46 }
 0x13a   :  { %v178_v50 = vmax.f32 %v176_v48, 0.0  ;;  %v177_v51 = vmax.f32 %v175_v49, 0.0 }
 0x13c   :  { %v179_v52 = vpack.c.bf16 %v178_v50, %v177_v51 }
 0x13e   :  { %521 = vmatmul.mubr.bf16.vlgmr.msra.gmra.mrb[0].mxu1 %v179_v52 }
 0x211   :  { %v278_v61 = vpop.f32.mrb[0].mxu1 }
 0x212   :  { %v290_v62 = vrot.slane %v278_v61, 4  ;;  %v522_v63 = vpop.f32.mrb[1].mxu1 }
 0x213   :  { %v281_v1 = vpop.f32.mrb[2].mxu1 }
 0x214   :  { %v291_v2 = vadd.f32 %v290_v62, %v278_v61  ;;  %v523_v3 = vpop.f32.mrb[3].mxu1 }
 0x216   :  { %v292_v4 = vrot.slane %v291_v2, 2 }
 0x218   :  { %v293_v5 = vadd.f32 %v292_v4, %v291_v2 }
 0x21a   :  { %v294_v6 = vrot.slane %v293_v5, 1 }
 0x21c   :  { %v295_v7 = vadd.f32 %v294_v6, %v293_v5 }
 0x21e   :  { %v296_v8 = vmul.f32 0.125, %v295_v7 }
 0x220   :  { %v297_v9 = vsub.f32 %v278_v61, %v296_v8 }
 0x222   :  { %v301_v10 = vmul.f32 %v297_v9, %v297_v9 }
 0x224   :  { %v304_v11 = vrot.slane %v301_v10, 4 }
 0x226   :  { %v305_v12 = vadd.f32 %v304_v11, %v301_v10 }
 0x228   :  { %v306_v13 = vrot.slane %v305_v12, 2 }
 0x22a   :  { %v307_v14 = vadd.f32 %v306_v13, %v305_v12 }
 0x22c   :  { %v308_v0 = vrot.slane %v307_v14, 1 }
 0x22e   :  { %v309_v15 = vadd.f32 %v308_v0, %v307_v14 }
 0x230   :  { %v310_v16 = vmul.f32 0.125, %v309_v15 }
 0x232   :  { %v311_v17 = vadd.f32 1e-05, %v310_v16 }
 0x234   :  { %570 = vrsqrt.f32 %v311_v17 }
 0x23e   :  { %v571_v19 = vpop.eup %570 }
 0x23f   :  { %v313_v20 = vmul.f32 %v571_v19, %v285_v18 }
 0x241   :  { %v314_v22 = vmul.f32 %v313_v20, %v296_v8  ;;  %v320_v23 = vrot.slane %v313_v20, %v729_v38 }
 0x243   :  { %v315_v24 = vsub.f32 %v286_v21, %v314_v22  ;;  %v323_v25 = vmul.f32 %v320_v23, %v281_v1  ;;  %v322_v26 = vmul.f32 %v320_v23, %v278_v61 }
 0x245   :  { %v328_v27 = vrot.slane %v315_v24, %v729_v38 }
 0x247   :  { %v330_v28 = vadd.f32 %v328_v27, %v322_v26  ;;  %v331_v29 = vadd.f32 %v328_v27, %v323_v25 }
 0x249   :  { %v332_v30 = vmax.f32 %v330_v28, 0.0  ;;  %v333_v31 = vmax.f32 %v331_v29, 0.0 }
 0x24b   :  { %v334_v32 = vpack.c.bf16 %v333_v31, %v332_v30 }
 0x24d   :  { %541 = vmatmul.mubr.bf16.vlgmr.msra.gmra.mrb[4].mxu0 %v334_v32 }
 0x320   :  { %v440_v34 = vpop.f32.mrb[4].mxu0 }
 0x321   :  { %v441_v35 = vadd.f32 %v466_v33, %v440_v34  ;;  %v542_v36 = vpop.f32.mrb[5].mxu0 }
 0x322   :  { %v443_v37 = vpop.f32.mrb[6].mxu0 }
 0x323   :  { %447 = vst [vmem:[%s769_s9] sm:$0xff] %v441_v35  ;;  %v444_v39 = vadd.f32 %v466_v33, %v443_v37  ;;  %v543_v38 = vpop.f32.mrb[7].mxu0 }
 0x325   :  { %448 = vst [vmem:[%s769_s9 + $0x8] sm:$0xff] %v444_v39 }
 0x326   :  { %453 = vsyncpa [#allocation3], 1 }
 0x327   :  { %454 = vsyncpa [#allocation5], 1 }

</bundles_post_ra>
